<compile_context>
chip_gen: v6e
topology: v6e:2x2x1
jax: 0.10.0
libtpu: 0.0.40
codegen_flags: <defaults>
</compile_context>

<pallas_src>
import functools

import jax
import jax.numpy as jnp
from jax.experimental import pallas as pl
from jax.experimental.pallas import tpu as pltpu


def _round_up(x: int, m: int) -> int:
    return ((x + m - 1) // m) * m


def _discriminator_kernel(x_ref, w1_ref, b1_ref, w2_ref, b2_ref, o_ref):
    # x_ref : (TB, F) f32    w1_ref: (F, H) bf16    b1_ref: (1, H) f32
    # w2_ref: (1, H)  f32    b2_ref: (1, 1) f32     o_ref : (1, TB) f32
    #
    # Hidden layer on the MXU: x is read from HBM as f32 (single pass) and cast
    # to bf16 here -- the cast is free (VPU/MXU slack), accumulation is f32.
    x = x_ref[...].astype(jnp.bfloat16)
    h = jnp.dot(x, w1_ref[...], preferred_element_type=jnp.float32) + b1_ref[...]
    # LeakyReLU(0.1) on the VPU.
    h = jnp.where(h > 0, h, 0.1 * h)
    # Output layer (128 -> 1) without an N=1 MXU matmul: multiply by the w2 row
    # (lane broadcast), transpose the tile-aligned (TB, H) block on the XLU and
    # sublane-reduce, so the result is lane-dense (batch along lanes).
    p = h * w2_ref[...]                                     # (TB, H)
    z = jnp.sum(p.T, axis=0, keepdims=True) + b2_ref[...]   # (1, TB)
    # Sigmoid: exp + approx reciprocal, both routed to the EUP.
    o_ref[...] = pl.reciprocal(1.0 + jnp.exp(-z), approx=True).astype(o_ref.dtype)


def _choose_batch_tile(batch: int, block_b: int) -> int:
    """Per-grid-step batch tile (rows)."""
    b8 = _round_up(batch, 8)
    if b8 <= 256:
        # Single tile: block spans the whole (sublane-rounded) batch, so any
        # multiple of 8 is a legal block / output lane width.
        return b8
    # Multi-tile: lane-dense (1, tb) output blocks need tb % 128 == 0.  Cap the
    # tile at half the batch so the grid has >= 2 steps (v7x megacore).
    tb = min(_round_up(block_b, 128), _round_up((batch + 1) // 2, 128))
    return max(tb, 128)


@functools.partial(jax.jit, static_argnames=("block_b", "min_pallas_batch"))
def discriminator_forward(x, w1, b1, w2, b2, *, block_b=2048, min_pallas_batch=0):
    """x: (B, F) f32; w1: (F, H); b1: (H,); w2: (H, 1); b2: (1,). Returns (B, 1) f32.

    block_b: target batch tile.  2048 keeps the double-buffered f32 x tile
    (~12.5 MiB) inside the explicit 48 MiB VMEM limit on every generation;
    raise to 4096 on v6e/v7x if desired.
    min_pallas_batch: if B < this threshold, run plain XLA ops instead (a
    single overhead-dominated Pallas step is slower for tiny B).  Default 0
    so the Pallas path is always exercised.
    """
    B, F = x.shape
    H = w1.shape[1]

    if B < min_pallas_batch:
        h = x @ w1 + b1
        h = jnp.where(h > 0, h, 0.1 * h)
        return jax.nn.sigmoid(h @ w2 + b2)

    # Small operands prepped once in the wrapper (w1 is tiny; x is untouched).
    w1_p = w1.astype(jnp.bfloat16)                      # (F, H) ~200 KiB
    b1_2d = b1.reshape(1, H).astype(jnp.float32)
    w2_row = w2.reshape(1, H).astype(jnp.float32)       # lane-dense (1, H) row
    b2_2d = b2.reshape(1, 1).astype(jnp.float32)

    tb = _choose_batch_tile(B, block_b)
    grid = pl.cdiv(B, tb)
    b_eff = grid * tb                                    # rows actually produced

    cost = pl.CostEstimate(
        flops=2 * b_eff * F * H + 4 * b_eff * H,
        transcendentals=2 * b_eff,
        bytes_accessed=4 * b_eff * F + 2 * F * H + 4 * (2 * H + 1) + 4 * b_eff,
    )

    out = pl.pallas_call(
        _discriminator_kernel,
        out_shape=jax.ShapeDtypeStruct((1, b_eff), jnp.float32),
        grid_spec=pltpu.PrefetchScalarGridSpec(
            num_scalar_prefetch=0,
            grid=(grid,),
            in_specs=[
                pl.BlockSpec((tb, F), lambda i: (i, 0)),   # x: streamed f32 tiles
                pl.BlockSpec((F, H), lambda i: (0, 0)),    # w1: VMEM-resident bf16
                pl.BlockSpec((1, H), lambda i: (0, 0)),    # b1
                pl.BlockSpec((1, H), lambda i: (0, 0)),    # w2 row
                pl.BlockSpec((1, 1), lambda i: (0, 0)),    # b2
            ],
            out_specs=pl.BlockSpec((1, tb), lambda i: (0, i)),  # lane-dense output
        ),
        compiler_params=pltpu.CompilerParams(
            dimension_semantics=("parallel",),   # batch tiles shard across TCs
            vmem_limit_bytes=48 * 1024 * 1024,   # covers tb=2048 f32 x on v5e too
        ),
        cost_estimate=cost,
    )(x, w1_p, b1_2d, w2_row, b2_2d)

    return out[0, :B].reshape(B, 1)


def init_params(key, in_features=784, hidden=128):
    """Deterministic init mimicking nn.Linear's default U(-1/sqrt(fan_in), 1/sqrt(fan_in))."""
    k1, k2, k3, k4 = jax.random.split(key, 4)
    bound1 = 1.0 / jnp.sqrt(in_features)
    bound2 = 1.0 / jnp.sqrt(hidden)
    # Stored as (in, out) so the kernel does x @ W (PyTorch stores (out, in)).
    w1 = jax.random.uniform(k1, (in_features, hidden), jnp.float32, -bound1, bound1)
    b1 = jax.random.uniform(k2, (hidden,), jnp.float32, -bound1, bound1)
    w2 = jax.random.uniform(k3, (hidden, 1), jnp.float32, -bound2, bound2)
    b2 = jax.random.uniform(k4, (1,), jnp.float32, -bound2, bound2)
    return w1, b1, w2, b2


if __name__ == "__main__":
    key = jax.random.PRNGKey(0)
    k_data, k_params = jax.random.split(key)

    batch = 8
    in_features = 784  # flattened 28x28 MNIST, matches the module default

    x = jax.random.normal(k_data, (batch, in_features), jnp.float32)
    w1, b1, w2, b2 = init_params(k_params, in_features=in_features, hidden=128)

    out = discriminator_forward(x, w1, b1, w2, b2)
    out = jax.block_until_ready(out)

    # Pure-JAX f32 reference (PyTorch semantics); kernel uses bf16 matmul inputs
    # with f32 accumulation and an approx reciprocal, so compare at bf16-level
    # tolerance.
    h_ref = x @ w1 + b1
    h_ref = jnp.where(h_ref > 0, h_ref, 0.1 * h_ref)
    ref = jax.nn.sigmoid(h_ref @ w2 + b2)

    assert out.shape == (batch, 1), out.shape
    assert jnp.allclose(out, ref, atol=2e-2, rtol=2e-2), (
        "mismatch vs JAX reference:\n%s\n%s" % (out, ref)
    )

    print("KERNEL_OK")
</pallas_src>

<mosaic_0001>
module attributes {stable_mosaic.version = 11 : i64} {
  func.func @_discriminator_kernel(%arg0: i32, %arg1: memref<8x784xf32, #tpu.memory_space<vmem>>, %arg2: memref<784x128xbf16, #tpu.memory_space<vmem>>, %arg3: memref<1x128xf32, #tpu.memory_space<vmem>>, %arg4: memref<1x128xf32, #tpu.memory_space<vmem>>, %arg5: memref<1x1xf32, #tpu.memory_space<vmem>>, %arg6: memref<1x8xf32, #tpu.memory_space<vmem>>) attributes {dimension_semantics = [#tpu.dimension_semantics<parallel>], iteration_bounds = array<i64: 1>, scalar_prefetch = 0 : i64, scratch_operands = 0 : i64, tpu.core_type = #tpu.core_type<tc>, window_params = [{transform_indices = @transform_0, window_bounds = array<i64: 8, 784>}, {pipeline_mode = #tpu.pipeline_mode<synchronous>, transform_indices = @transform_1, window_bounds = array<i64: 784, 128>}, {pipeline_mode = #tpu.pipeline_mode<synchronous>, transform_indices = @transform_2, window_bounds = array<i64: 1, 128>}, {pipeline_mode = #tpu.pipeline_mode<synchronous>, transform_indices = @transform_3, window_bounds = array<i64: 1, 128>}, {pipeline_mode = #tpu.pipeline_mode<synchronous>, transform_indices = @transform_4, window_bounds = array<i64: 1, 1>}, {transform_indices = @transform_5, window_bounds = array<i64: 1, 8>}]} {
    %c0 = arith.constant 0 : index
    %c0_0 = arith.constant 0 : index
    %0 = vector.load %arg1[%c0, %c0_0] : memref<8x784xf32, #tpu.memory_space<vmem>>, vector<8x784xf32>
    %1 = arith.truncf %0 : vector<8x784xf32> to vector<8x784xbf16>
    %c0_1 = arith.constant 0 : index
    %c0_2 = arith.constant 0 : index
    %2 = vector.load %arg2[%c0_1, %c0_2] : memref<784x128xbf16, #tpu.memory_space<vmem>>, vector<784x128xbf16>
    %cst = arith.constant dense<0.000000e+00> : vector<8x128xf32>
    %3 = tpu.matmul %1, %2, %cst {dimension_numbers = #tpu.dot_dimension_numbers<[1], [0], [0], [1], [0, 0, 1, 1], [], []>} : vector<8x784xbf16>, vector<784x128xbf16>, vector<8x128xf32> -> vector<8x128xf32>
    %c0_3 = arith.constant 0 : index
    %c0_4 = arith.constant 0 : index
    %4 = vector.load %arg3[%c0_3, %c0_4] : memref<1x128xf32, #tpu.memory_space<vmem>>, vector<1x128xf32>
    %5 = vector.broadcast %4 : vector<1x128xf32> to vector<8x128xf32>
    %6 = arith.addf %3, %5 : vector<8x128xf32>
    %cst_5 = arith.constant 0.000000e+00 : f32
    %7 = vector.broadcast %cst_5 : f32 to vector<8x128xf32>
    %8 = arith.cmpf ogt, %6, %7 : vector<8x128xf32>
    %cst_6 = arith.constant 1.000000e-01 : f32
    %9 = vector.broadcast %cst_6 : f32 to vector<8x128xf32>
    %10 = arith.mulf %9, %6 : vector<8x128xf32>
    %11 = arith.select %8, %6, %10 : vector<8x128xi1>, vector<8x128xf32>
    %c0_7 = arith.constant 0 : index
    %c0_8 = arith.constant 0 : index
    %12 = vector.load %arg4[%c0_7, %c0_8] : memref<1x128xf32, #tpu.memory_space<vmem>>, vector<1x128xf32>
    %13 = vector.broadcast %12 : vector<1x128xf32> to vector<8x128xf32>
    %14 = arith.mulf %11, %13 : vector<8x128xf32>
    %15 = tpu.transpose %14, [1, 0] : vector<8x128xf32> -> vector<128x8xf32>
    %cst_9 = arith.constant dense<0.000000e+00> : vector<8xf32>
    %16 = vector.multi_reduction <add>, %15, %cst_9 [0] : vector<128x8xf32> to vector<8xf32>
    %17 = vector.shape_cast %16 : vector<8xf32> to vector<1x8xf32>
    %c0_10 = arith.constant 0 : index
    %c0_11 = arith.constant 0 : index
    %18 = vector.load %arg5[%c0_10, %c0_11] : memref<1x1xf32, #tpu.memory_space<vmem>>, vector<1x1xf32>
    %19 = vector.broadcast %18 : vector<1x1xf32> to vector<1x8xf32>
    %20 = arith.addf %17, %19 : vector<1x8xf32>
    %cst_12 = arith.constant 0.000000e+00 : f32
    %21 = vector.broadcast %cst_12 : f32 to vector<1x8xf32>
    %22 = arith.subf %21, %20 : vector<1x8xf32>
    %23 = math.exp %22 : vector<1x8xf32>
    %cst_13 = arith.constant 1.000000e+00 : f32
    %24 = vector.broadcast %cst_13 : f32 to vector<1x8xf32>
    %25 = arith.addf %24, %23 : vector<1x8xf32>
    %26 = tpu.reciprocal %25 {approx = true} : vector<1x8xf32> -> vector<1x8xf32>
    %c0_14 = arith.constant 0 : index
    %c0_15 = arith.constant 0 : index
    %27 = vector.load %arg6[%c0_14, %c0_15] : memref<1x8xf32, #tpu.memory_space<vmem>>, vector<1x8xf32>
    tpu.vector_store %arg6[%c0_14, %c0_15], %26 {strides = array<i32>} : memref<1x8xf32, #tpu.memory_space<vmem>>, vector<1x8xf32>,
    return
  }
  func.func @transform_0(%arg0: i32) -> (i32, i32) {
    %c0_i32 = arith.constant 0 : i32
    %c0_i32_0 = arith.constant 0 : i32
    return %arg0, %c0_i32 : i32, i32
  }
  func.func @transform_1(%arg0: i32) -> (i32, i32) {
    %c0_i32 = arith.constant 0 : i32
    %c0_i32_0 = arith.constant 0 : i32
    %c0_i32_1 = arith.constant 0 : i32
    return %c0_i32, %c0_i32_0 : i32, i32
  }
  func.func @transform_2(%arg0: i32) -> (i32, i32) {
    %c0_i32 = arith.constant 0 : i32
    %c0_i32_0 = arith.constant 0 : i32
    %c0_i32_1 = arith.constant 0 : i32
    return %c0_i32, %c0_i32_0 : i32, i32
  }
  func.func @transform_3(%arg0: i32) -> (i32, i32) {
    %c0_i32 = arith.constant 0 : i32
    %c0_i32_0 = arith.constant 0 : i32
    %c0_i32_1 = arith.constant 0 : i32
    return %c0_i32, %c0_i32_0 : i32, i32
  }
  func.func @transform_4(%arg0: i32) -> (i32, i32) {
    %c0_i32 = arith.constant 0 : i32
    %c0_i32_0 = arith.constant 0 : i32
    %c0_i32_1 = arith.constant 0 : i32
    return %c0_i32, %c0_i32_0 : i32, i32
  }
  func.func @transform_5(%arg0: i32) -> (i32, i32) {
    %c0_i32 = arith.constant 0 : i32
    %c0_i32_0 = arith.constant 0 : i32
    return %c0_i32, %arg0 : i32, i32
  }
}

</mosaic_0001>

<bundles_post_ra>
// kernel: discriminator_forward.1
= control target key start
LH: loop header
LB: loop body
LE: loop exit
PB: predicated region body
PF: predicated region fallthrough
CT: control target
= control target key end

     0   :  { %s1150_s0 = inlined_call_operand.vmem [shape: f32[8,784], index: 0, kind: input, shape index: {}]   ;;  %s1151_s1 = inlined_call_operand.vmem [shape: bf16[784,128], index: 1, kind: input, shape index: {}]   ;;  %s1152_s2 = inlined_call_operand.vmem [shape: f32[1,128], index: 2, kind: input, shape index: {}]   ;;  %s1153_s3 = inlined_call_operand.vmem [shape: f32[1,128], index: 3, kind: input, shape index: {}]   ;;  %s1154_s4 = inlined_call_operand.<no memory space> [shape: f32[1,1], index: 4, kind: input, shape index: {}]   ;;  %s1155_s5 = inlined_call_operand.hbm [shape: f32[1,8], index: 5, kind: output, shape index: {}]  }
   0x1   :  { %v10_v0 = vstv %s1154_s4 }
   0x2   :  { %11 = vst [vmem:[#allocation2] sm:$0x1] %v10_v0 }
   0x3   :  { %v845_v1 = vld [vmem:[%s1151_s1 + $0x78] sm:$0xff]   ;;  %v849_v5 = vld [vmem:[%s1151_s1 + $0x70] sm:$0xff]   ;;  %v853_v9 = vld [vmem:[%s1151_s1 + $0x68] sm:$0xff]   ;;  %v920_v45 = vmov 0.0   ;;  %vm921_vm0 = vmmov 0  }
   0x4   :  { %v846_v2 = vld [vmem:[%s1151_s1 + $0x38] sm:$0xff]   ;;  %766 = vmatprep.subr.bf16.mxu0 %v845_v1  ;;  %v850_v6 = vld [vmem:[%s1151_s1 + $0x30] sm:$0xff]   ;;  %v854_v10 = vld [vmem:[%s1151_s1 + $0x28] sm:$0xff]  }
   0x5   :  { %v847_v3 = vld [vmem:[%s1151_s1 + $0xf8] sm:$0xff]   ;;  %767 = vmatpush3.bf16.msra.mxu0 %v846_v2  ;;  %v851_v7 = vld [vmem:[%s1151_s1 + $0xf0] sm:$0xff]   ;;  %v855_v11 = vld [vmem:[%s1151_s1 + $0xe8] sm:$0xff]  }
   0x6   :  { %v848_v4 = vld [vmem:[%s1151_s1 + $0xb8] sm:$0xff]   ;;  %788 = vmatprep.subr.bf16.mxu1 %v847_v3  ;;  %768 = vmatprep.subr.bf16.mxu0 %v849_v5  ;;  %v852_v8 = vld [vmem:[%s1151_s1 + $0xb0] sm:$0xff]   ;;  %v856_v12 = vld [vmem:[%s1151_s1 + $0xa8] sm:$0xff]  }
   0x7   :  { %789 = vmatpush3.bf16.msra.mxu1 %v848_v4  ;;  %v857_v13 = vld [vmem:[%s1151_s1 + $0x60] sm:$0xff]   ;;  %v861_v17 = vld [vmem:[%s1151_s1 + $0x58] sm:$0xff]   ;;  %v865_v21 = vld [vmem:[%s1151_s1 + $0x50] sm:$0xff]  }
   0x8   :  { %790 = vmatprep.subr.bf16.mxu1 %v851_v7  ;;  %v858_v14 = vld [vmem:[%s1151_s1 + $0x20] sm:$0xff]   ;;  %v862_v18 = vld [vmem:[%s1151_s1 + $0x18] sm:$0xff]   ;;  %v866_v22 = vld [vmem:[%s1151_s1 + $0x10] sm:$0xff]  }
   0x9   :  { %769 = vmatpush3.bf16.msra.mxu0 %v850_v6  ;;  %v859_v15 = vld [vmem:[%s1151_s1 + $0xe0] sm:$0xff]   ;;  %v863_v19 = vld [vmem:[%s1151_s1 + $0xd8] sm:$0xff]   ;;  %v867_v23 = vld [vmem:[%s1151_s1 + $0xd0] sm:$0xff]  }
   0xa   :  { %770 = vmatprep.subr.bf16.mxu0 %v853_v9  ;;  %v860_v16 = vld [vmem:[%s1151_s1 + $0xa0] sm:$0xff]   ;;  %v864_v20 = vld [vmem:[%s1151_s1 + $0x98] sm:$0xff]   ;;  %v868_v24 = vld [vmem:[%s1151_s1 + $0x90] sm:$0xff]  }
   0xb   :  { %791 = vmatpush3.bf16.msra.mxu1 %v852_v8  ;;  %v869_v25 = vld [vmem:[%s1151_s1 + $0x48] sm:$0xff]   ;;  %v873_v29 = vld [vmem:[%s1151_s1 + $0x40] sm:$0xff]   ;;  %v877_v37 = vld [vmem:[%s1151_s1 + $0x178] sm:$0xff]  }
   0xc   :  { %792 = vmatprep.subr.bf16.mxu1 %v855_v11  ;;  %v870_v26 = vld [vmem:[%s1151_s1 + $0x8] sm:$0xff]   ;;  %v874_v30 = vld [vmem:[%s1151_s1] sm:$0xff]   ;;  %v27_v38 = vld [vmem:[%s1150_s0 + $0x18] sm:$0xff] }
   0xd   :  { %771 = vmatpush3.bf16.msra.mxu0 %v854_v10  ;;  %v871_v27 = vld [vmem:[%s1151_s1 + $0xc8] sm:$0xff]   ;;  %v875_v31 = vld [vmem:[%s1151_s1 + $0xc0] sm:$0xff]   ;;  %v34_v39 = vpack.c.bf16 %v27_v38, %v27_v38  ;;  %v878_v40 = vld [vmem:[%s1151_s1 + $0x138] sm:$0xff]  }
   0xe   :  { %772 = vmatprep.subr.bf16.mxu0 %v857_v13  ;;  %v872_v28 = vld [vmem:[%s1151_s1 + $0x88] sm:$0xff]   ;;  %v876_v34 = vld [vmem:[%s1151_s1 + $0x80] sm:$0xff]   ;;  %v26_v41 = vld [vmem:[%s1150_s0 + $0x10] sm:$0xff] }
   0xf   :  { %793 = vmatpush3.bf16.msra.mxu1 %v856_v12  ;;  %v25_v32 = vld [vmem:[%s1150_s0 + $0x8] sm:$0xff]  ;;  %v24_v35 = vld [vmem:[%s1150_s0] sm:$0xff]  ;;  %513 = vmatprep.mubr.bf16.mxu1 %v34_v39  ;;  %v33_v42 = vpack.c.bf16 %v26_v41, %v26_v41  ;;  %v879_v43 = vld [vmem:[%s1151_s1 + $0x170] sm:$0xff]  }
  0x10   :  { %794 = vmatprep.subr.bf16.mxu1 %v859_v15  ;;  %v32_v33 = vpack.c.bf16 %v25_v32, %v25_v32  ;;  %v31_v36 = vpack.c.bf16 %v24_v35, %v24_v35  ;;  %v880_v44 = vld [vmem:[%s1151_s1 + $0x130] sm:$0xff]   ;;  %v881_v46 = vld [vmem:[%s1151_s1 + $0x168] sm:$0xff]   ;;  %v883_v48 = vld [vmem:[%s1151_s1 + $0x160] sm:$0xff]  }
  0x11   :  { %773 = vmatpush3.bf16.msra.mxu0 %v858_v14  ;;  %v882_v47 = vld [vmem:[%s1151_s1 + $0x128] sm:$0xff]   ;;  %v884_v49 = vld [vmem:[%s1151_s1 + $0x120] sm:$0xff]   ;;  %v885_v50 = vld [vmem:[%s1151_s1 + $0x158] sm:$0xff]  }
  0x12   :  { %774 = vmatprep.subr.bf16.mxu0 %v861_v17  ;;  %473 = vmatprep.mubr.bf16.mxu0 %v32_v33  ;;  %v886_v51 = vld [vmem:[%s1151_s1 + $0x118] sm:$0xff]   ;;  %v887_v52 = vld [vmem:[%s1151_s1 + $0x150] sm:$0xff]   ;;  %v893_v53 = vld [vmem:[%s1151_s1 + $0x180] sm:$0xff]  }
  0x13   :  { %795 = vmatpush3.bf16.msra.mxu1 %v860_v16  ;;  %v29_v54 = vld [vmem:[%s1150_s0 + $0x28] sm:$0xff]  ;;  %v30_v56 = vld [vmem:[%s1150_s0 + $0x30] sm:$0xff] }
  0x14   :  { %796 = vmatprep.subr.bf16.mxu1 %v863_v19  ;;  %v36_v55 = vpack.c.bf16 %v29_v54, %v29_v54 }
  0x15   :  { %775 = vmatpush3.bf16.msra.mxu0 %v862_v18 }
  0x16   :  { %776 = vmatprep.subr.bf16.mxu0 %v865_v21 }
  0x17   :  { %797 = vmatpush3.bf16.msra.mxu1 %v864_v20 }
  0x18   :  { %798 = vmatprep.subr.bf16.mxu1 %v867_v23 }
  0x19   :  { %777 = vmatpush3.bf16.msra.mxu0 %v866_v22 }
  0x1a   :  { %778 = vmatprep.subr.bf16.mxu0 %v869_v25 }
  0x1b   :  { %799 = vmatpush3.bf16.msra.mxu1 %v868_v24 }
  0x1c   :  { %800 = vmatprep.subr.bf16.mxu1 %v871_v27 }
  0x1d   :  { %779 = vmatpush3.bf16.msra.mxu0 %v870_v26 }
  0x1e   :  { %780 = vmatprep.subr.bf16.mxu0 %v873_v29 }
  0x1f   :  { %801 = vmatpush3.bf16.msra.mxu1 %v872_v28 }
  0x20   :  { %802 = vmatprep.subr.bf16.mxu1 %v875_v31 }
  0x21   :  { %781 = vmatpush3.bf16.msra.mxu0 %v874_v30 }
  0x22   :  { %810 = vmatprep.subr.bf16.mxu0 %v877_v37 }
  0x23   :  { %803 = vmatpush3.bf16.msra.mxu1 %v876_v34 }
  0x24   :  { %474 = vmatmul.mubr.bf16.vlgmr.msra.gmra.mxu0 %v31_v36  ;;  %834 = vmatprep.subr.bf16.mxu1 %v920_v45 }
  0x25   :  { %811 = vmatpush3.bf16.msra.mxu0 %v878_v40 }
  0x26   :  { %514 = vmatmul.mubr.bf16.vlgmr.msra.gmra.mxu1 %v33_v42  ;;  %812 = vmatprep.subr.bf16.mxu0 %v879_v43 }
  0x27   :  { %836 = vmatprep.mubr.msk.bf16.mxu1 %vm921_vm0, %v920_v45 }
  0x29   :  { %813 = vmatpush3.bf16.msra.mxu0 %v880_v44 }
  0x2a   :  { %814 = vmatprep.subr.bf16.mxu0 %v881_v46 }
  0x2d   :  { %815 = vmatpush3.bf16.msra.mxu0 %v882_v47 }
  0x2e   :  { %816 = vmatprep.subr.bf16.mxu0 %v883_v48 }
  0x31   :  { %817 = vmatpush3.bf16.msra.mxu0 %v884_v49 }
  0x32   :  { %818 = vmatprep.subr.bf16.mxu0 %v885_v50 }
  0x33   :  { %12 = vsyncpa [#allocation4], 0  ;;  %v888_v57 = vld [vmem:[%s1151_s1 + $0x110] sm:$0xff]   ;;  %835 = vmatpush3.bf16.msra.mxu1 %v893_v53  ;;  %v37_v58 = vpack.c.bf16 %v30_v56, %v30_v56  ;;  %vm437_vm1 = vcmask 130048   ;;  %v889_v59 = vld [vmem:[%s1151_s1 + $0x148] sm:$0xff]   ;;  %553 = vmatprep.mubr.bf16.mxu0 %v36_v55  ;;  %v922_v29 = vmov 0  }
  0x34   :  { %v890_v60 = vld [vmem:[%s1151_s1 + $0x108] sm:$0xff]   ;;  %v891_v61 = vld [vmem:[%s1151_s1 + $0x140] sm:$0xff]   ;;  %vm644_vm3 = vcmask 64512   ;;  %vm698_vm4 = vcmask 57344  }
  0x35   :  { %819 = vmatpush3.bf16.msra.mxu0 %v886_v51  ;;  %v892_v62 = vld [vmem:[%s1151_s1 + $0x100] sm:$0xff]  }
  0x36   :  { %820 = vmatprep.subr.bf16.mxu0 %v887_v52  ;;  %837 = vmatmul.mubr.msk.bf16.vlgmr.msra.gmra.mxu1 %vm437_vm1, %v37_v58  ;;  %v28_v63 = vld [vmem:[%s1150_s0 + $0x20] sm:$0xff] }
  0x37   :  { %v35_v0 = vpack.c.bf16 %v28_v63, %v28_v63  ;;  %v714_v14 = vld [vmem:[%s1152_s2] ss:$0 sm:$0xff]  ;;  %s923_s2 = smov [#allocation3]  }
  0x38   :  { %v765_v26 = vld [vmem:[%s1153_s3] ss:$0 sm:$0xff]  ;;  %s706_s3 = sshll.u32 %s923_s2, 4  ;;  %s707_s3 = int_to_ptr.vmem [resolvable:$true] %s706_s3 }
  0x39   :  { %821 = vmatpush3.bf16.msra.mxu0 %v888_v57  ;;  %v682_v30 = vld [vmem:[#allocation2] sm:$0x1]  ;;  %s898_s29 = scalar_lea.vmem %s707_s3, 16  ;;  %s902_s30 = scalar_lea.vmem %s707_s3, 32 }
  0x3a   :  { %822 = vmatprep.subr.bf16.mxu0 %v889_v59  ;;  %p899_p0 = scmp.ne.s32.totalorder %s707_s3, %s898_s29  ;;  %p903_p1 = scmp.lt.s32.totalorder %s707_s3, %s707_s3 }
  0x3b   :  { %p904_p2 = scmp.lt.s32.totalorder %s902_s30, %s898_s29 }
  0x3d   :  { %823 = vmatpush3.bf16.msra.mxu0 %v890_v60  ;;  %p905_p3 = por %p904_p2, %p903_p1 }
  0x3e   :  { %824 = vmatprep.subr.bf16.mxu0 %v891_v61 }
  0x3f   :  { %p906_p4 = pnand %p905_p3, %p899_p0 }
  0x41   :  { %825 = vmatpush3.bf16.msra.mxu0 %v892_v62 }
  0x44   :  { %554 = vmatmul.mubr.bf16.vlgmr.msra.gmra.mxu0 %v35_v0 }
  0xe4   :  { %v782_v1 = vpop.f32.mrf.mxu0 }
  0xe6   :  { %v783_v2 = vpop.f32.mrf.mxu0  ;;  %v804_v3 = vpop.f32.mrf.mxu1 }
  0xe7   :  { %v784_v13 = vadd.f32 %v783_v2, %v782_v1 }
  0xe8   :  { %v785_v4 = vpop.f32.mrf.mxu0  ;;  %v805_v5 = vpop.f32.mrf.mxu1 }
  0xe9   :  { %v476_v15 = vadd.f32 %v784_v13, %v714_v14  ;;  %v806_v16 = vadd.f32 %v805_v5, %v804_v3 }
  0xea   :  { %v786_v6 = vpop.f32.mrf.mxu0  ;;  %v807_v7 = vpop.f32.mrf.mxu1 }
  0xeb   :  { %v516_v19 = vadd.f32 %v806_v16, %v476_v15 }
  0xec   :  { %v808_v8 = vpop.f32.mrf.mxu1 }
  0xf6   :  { %v595_v9 = vpop.f32.mrf.mxu1 }
  0xf8   :  { %v838_v10 = vpop.f32.mrf.mxu1 }
  0xfa   :  { %v598_v11 = vpop.f32.mrf.mxu1 }
  0xfc   :  { %v839_v12 = vpop.f32.mrf.mxu1 }
 0x104   :  { %v826_v17 = vpop.f32.mrf.mxu0 }
 0x106   :  { %v827_v18 = vpop.f32.mrf.mxu0 }
 0x107   :  { %v828_v20 = vadd.f32 %v827_v18, %v826_v17  ;;  %v688_v17 = vlaneseq }
 0x108   :  { %v829_v21 = vpop.f32.mrf.mxu0 }
 0x109   :  { %v556_v22 = vadd.f32 %v828_v20, %v516_v19  ;;  %v689_v19 = vshrl.u32 %v688_v17, 7 }
 0x10a   :  { %v830_v23 = vpop.f32.mrf.mxu0 }
 0x10b   :  { %v596_v24 = vadd.f32 %v595_v9, %v556_v22  ;;  %v690_v21 = vsub.s32 0, %v689_v19 }
 0x10d   :  { %vm601_vm2 = vcmp.gt.f32.partialorder %v596_v24, 0.0  ;;  %v602_v25 = vmul.f32 0.1, %v596_v24 }
 0x10f   :  { %v603_v27 = vsel %vm601_vm2, %v596_v24, %v602_v25 }
 0x110   :  { %v611_v28 = vmul.f32 %v765_v26, %v603_v27 }
 0x112   :  { %612 = vxpose.xlu0.b32.start.end [1/1] (short) %v611_v28, 128 }
 0x13b   :  { %844 = vset.pattern.permute.xlu0 %v922_v29 }
 0x177   :  { %685 = vperm.xlu0 %844, %v682_v30  }
 0x18e   :  { %v628_v31 = vpop.trf.xlu0 }
 0x18f   :  { %v645_v37 = vsel %vm644_vm3, %v628_v31, 0.0 }
 0x192   :  { %v629_v32 = vpop.trf.xlu0 }
 0x193   :  { %v646_v38 = vsel %vm644_vm3, %v629_v32, 0.0 }
 0x194   :  { %v647_v40 = vadd.f32 %v646_v38, %v645_v37 }
 0x196   :  { %v630_v33 = vpop.trf.xlu0 }
 0x197   :  { %v648_v41 = vsel %vm644_vm3, %v630_v33, 0.0 }
 0x198   :  { %v649_v43 = vadd.f32 %v648_v41, %v647_v40 }
 0x19a   :  { %v631_v34 = vpop.trf.xlu0 }
 0x19b   :  { %v650_v44 = vsel %vm644_vm3, %v631_v34, 0.0 }
 0x19c   :  { %v651_v46 = vadd.f32 %v650_v44, %v649_v43 }
 0x19e   :  { %v632_v35 = vpop.trf.xlu0 }
 0x19f   :  { %v652_v47 = vsel %vm644_vm3, %v632_v35, 0.0 }
 0x1a0   :  { %v653_v49 = vadd.f32 %v652_v47, %v651_v46 }
 0x1a2   :  { %v633_v36 = vpop.trf.xlu0 }
 0x1a3   :  { %v654_v50 = vsel %vm644_vm3, %v633_v36, 0.0 }
 0x1a4   :  { %v655_v51 = vadd.f32 %v654_v50, %v653_v49 }
 0x1a6   :  { %v634_v39 = vpop.trf.xlu0 }
 0x1a7   :  { %v656_v53 = vsel %vm644_vm3, %v634_v39, 0.0 }
 0x1a8   :  { %v657_v54 = vadd.f32 %v656_v53, %v655_v51 }
 0x1aa   :  { %v635_v42 = vpop.trf.xlu0 }
 0x1ab   :  { %v658_v55 = vsel %vm644_vm3, %v635_v42, 0.0 }
 0x1ac   :  { %v659_v57 = vadd.f32 %v658_v55, %v657_v54 }
 0x1ae   :  { %v636_v45 = vpop.trf.xlu0 }
 0x1af   :  { %v660_v58 = vsel %vm644_vm3, %v636_v45, 0.0 }
 0x1b0   :  { %v661_v59 = vadd.f32 %v660_v58, %v659_v57 }
 0x1b2   :  { %v637_v48 = vpop.trf.xlu0 }
 0x1b3   :  { %v662_v61 = vsel %vm644_vm3, %v637_v48, 0.0 }
 0x1b4   :  { %v663_v62 = vadd.f32 %v662_v61, %v661_v59 }
 0x1b6   :  { %v638_v52 = vpop.trf.xlu0 }
 0x1b7   :  { %v664_v63 = vsel %vm644_vm3, %v638_v52, 0.0 }
 0x1b8   :  { %v665_v1 = vadd.f32 %v664_v63, %v663_v62 }
 0x1ba   :  { %v639_v56 = vpop.trf.xlu0 }
 0x1bb   :  { %v666_v2 = vsel %vm644_vm3, %v639_v56, 0.0 }
 0x1bc   :  { %v667_v3 = vadd.f32 %v666_v2, %v665_v1 }
 0x1be   :  { %v640_v60 = vpop.trf.xlu0 }
 0x1bf   :  { %v668_v5 = vsel %vm644_vm3, %v640_v60, 0.0 }
 0x1c0   :  { %v669_v6 = vadd.f32 %v668_v5, %v667_v3 }
 0x1c2   :  { %v641_v0 = vpop.trf.xlu0 }
 0x1c3   :  { %v670_v7 = vsel %vm644_vm3, %v641_v0, 0.0 }
 0x1c4   :  { %v671_v10 = vadd.f32 %v670_v7, %v669_v6 }
 0x1c6   :  { %v642_v4 = vpop.trf.xlu0 }
 0x1c7   :  { %v672_v9 = vsel %vm644_vm3, %v642_v4, 0.0 }
 0x1c8   :  { %v673_v12 = vadd.f32 %v672_v9, %v671_v10 }
 0x1ca   :  { %v643_v8 = vpop.trf.xlu0 }
 0x1cb   :  { %v674_v11 = vsel %vm644_vm3, %v643_v8, 0.0 }
 0x1cc   :  { %v675_v13 = vadd.f32 %v674_v11, %v673_v12 }
 0x1ce   :  { %v676_v14 = vrot.slane %v675_v13, 4 }
 0x1d0   :  { %v677_v15 = vadd.f32 %v676_v14, %v675_v13 }
 0x1d2   :  { %v678_v16 = vrot.slane %v677_v15, 2 }
 0x1d4   :  { %v679_v18 = vadd.f32 %v678_v16, %v677_v15 }
 0x1d6   :  { %v680_v20 = vrot.slane %v679_v18, 1 }
 0x1d8   :  { %v681_v23 = vadd.f32 %v680_v20, %v679_v18 }
 0x1f2   :  { %v686_v22 = vpop.permute.xlu0 %685 }
 0x1f3   :  { %v691_v24 = vrot.slane %v686_v22, %v690_v21 }
 0x1f5   :  { %v692_v25 = vadd.f32 %v691_v24, %v681_v23 }
 0x1f7   :  { %v693_v26 = vsub.f32 0.0, %v692_v25 }
 0x1f9   :  { %v694_v27 = vmul.f32 1.442695, %v693_v26 }
 0x1fb   :  { %894 = vpow2.f32 %v694_v27 }
 0x208   :  { %v895_v28 = vpop.eup %894 }
 0x209   :  { %v696_v29 = vadd.f32 1.0, %v895_v28 }
 0x20b   :  { %896 = vrcp.f32 %v696_v29 }
 0x218   :  { %v897_v30 = vpop.eup %896 }
 0x219   :  { %699 = vst.msk [vmem:[#allocation3] sm:$0x1] %vm698_vm4, %v897_v30 }
 0x21a   :  { %909 = shalt.err (!%p906_p4)
}
 0x21b   :  { %709 = dma.vmem_to_hbm [thread:$0]  %s707_s3, 16, %s1155_s5, [#allocation4]  }
 0x21c   :  { %918 = dma.done.wait [#allocation4], 16  }
 0x21d   :  { %919 = vsyncadd [#allocation4], 4294967280 }
 0x21e   :  { %713 = vsyncpa [#allocation4], 1 }

</bundles_post_ra>
